<compile_context>
chip_gen: v6e
topology: v6e:2x2x1
jax: 0.10.0
libtpu: 0.0.40
codegen_flags: <defaults>
</compile_context>

<pallas_src>
import math

import jax
import jax.numpy as jnp
from jax.experimental import pallas as pl
from jax.experimental.pallas import tpu as pltpu


def _emb_pos_kernel(ids_ref, pos_ref, table_hbm, out_ref, buf, sems):
    """One grid step = `tile_s` consecutive tokens of one batch row.

    ids_ref:   (B, S) int32, SMEM (scalar prefetch) -- used only for DMA addressing
    pos_ref:   (tile_s, D) f32, VMEM                -- positional rows for this block
    table_hbm: (V, D) f32, HBM (pl.ANY)             -- full table, never copied to VMEM
    out_ref:   (tile_s, D) f32, VMEM                -- block of the flattened (B*S, D) output
    buf:       (tile_s, D) f32, VMEM scratch        -- gather landing buffer
    sems:      (tile_s,) DMA semaphores             -- one per gathered row
    """
    b = pl.program_id(0)
    j = pl.program_id(1)
    tile_s = buf.shape[0]
    vocab = table_hbm.shape[0]
    base = j * tile_s

    # Issue all row-gather DMAs for this block (all in flight concurrently).
    @pl.loop(0, tile_s)
    def _(r):
        tok = ids_ref[b, base + r]
        # Clamp so an out-of-range id cannot DMA arbitrary HBM (nn.Embedding would
        # raise; this matches jnp.take's clamping semantics instead).
        tok = jnp.minimum(jnp.maximum(tok, 0), vocab - 1)
        pltpu.make_async_copy(table_hbm.at[pl.ds(tok, 1), :],
                              buf.at[pl.ds(r, 1), :],
                              sems.at[r]).start()

    # Wait for all row gathers (src index irrelevant for wait; shape must match).
    @pl.loop(0, tile_s)
    def _(r):
        pltpu.make_async_copy(table_hbm.at[pl.ds(0, 1), :],
                              buf.at[pl.ds(r, 1), :],
                              sems.at[r]).wait()

    out_ref[...] = buf[...] + pos_ref[...]


def _pick_tile(seq_len):
    """Largest multiple-of-8 divisor of seq_len, capped at 512 rows per grid step."""
    for cand in (512, 256, 128, 64, 32, 16, 8):
        if seq_len % cand == 0:
            return cand
    return seq_len


def embedding_with_position(ids, emb_table, pos_encoding):
    """ids: (B, S) int32; emb_table: (V, D) f32; pos_encoding: (L, D) f32, L >= S."""
    B, S = ids.shape
    V, D = emb_table.shape
    N = B * S
    pos = pos_encoding[:S, :]                     # slice to current seq length (glue)

    tile_s = _pick_tile(S)
    num_j = S // tile_s
    # (8, 128) block rule on the flattened (N, D) output slab.
    assert tile_s % 8 == 0 or tile_s == N, (
        f"seq len {S} needs a multiple-of-8 row tile for the flattened output")

    dtype = emb_table.dtype
    out_flat = pl.pallas_call(
        _emb_pos_kernel,
        out_shape=jax.ShapeDtypeStruct((N, D), dtype),
        grid_spec=pltpu.PrefetchScalarGridSpec(
            num_scalar_prefetch=1,                # ids -> SMEM, addressing only
            grid=(B, num_j),
            in_specs=[
                # positional-encoding rows for this block (small; stays pipelined)
                pl.BlockSpec((tile_s, D), lambda b, j, ids: (j, 0)),
                # embedding table left in HBM; gathered manually row-by-row
                pl.BlockSpec(memory_space=pl.ANY),
            ],
            out_specs=pl.BlockSpec((tile_s, D),
                                   lambda b, j, ids: (b * num_j + j, 0)),
            scratch_shapes=[
                pltpu.VMEM((tile_s, D), dtype),
                pltpu.SemaphoreType.DMA((tile_s,)),
            ]),
        compiler_params=pltpu.CompilerParams(
            dimension_semantics=("parallel", "parallel")),
    )(ids.astype(jnp.int32), pos, emb_table)

    return out_flat.reshape(B, S, D)


def make_pos_encoding(seq_max_len, dim):
    # Mirrors the PyTorch buffer construction exactly (interleaved sin/cos needs even dim).
    assert dim % 2 == 0, "EmbeddingWithPosition requires an even embedding dim"
    position_idx = jnp.arange(0, seq_max_len, dtype=jnp.float32)[:, None]
    div = jnp.exp(-jnp.arange(0, dim, 2, dtype=jnp.float32)
                  * math.log(10000.0) / dim)
    fill = position_idx * div                                  # (L, D/2)
    pe = jnp.zeros((seq_max_len, dim), dtype=jnp.float32)
    pe = pe.at[:, 0::2].set(jnp.sin(fill))
    pe = pe.at[:, 1::2].set(jnp.cos(fill))
    return pe


if __name__ == "__main__":
    # Small, deterministic problem sizes.
    vocab_size, dim, seq_max_len = 64, 32, 16
    batch, seq = 2, 8

    key = jax.random.PRNGKey(0)
    k_emb, k_ids = jax.random.split(key)

    # Deterministic "parameters" (nn.Embedding weight ~ N(0,1)).
    emb_table = jax.random.normal(k_emb, (vocab_size, dim), dtype=jnp.float32)
    pos_encoding = make_pos_encoding(seq_max_len, dim)

    ids = jax.random.randint(k_ids, (batch, seq), 0, vocab_size, dtype=jnp.int32)

    out = embedding_with_position(ids, emb_table, pos_encoding)
    out = jax.block_until_ready(out)

    # Reference check (plain JAX) for correctness.
    ref = jnp.take(emb_table, ids, axis=0) + pos_encoding[None, :seq, :]
    assert out.shape == (batch, seq, dim)
    assert jnp.allclose(out, ref, atol=1e-6, rtol=1e-6)

    print("KERNEL_OK")
</pallas_src>

<mosaic_0001>
module attributes {stable_mosaic.version = 11 : i64} {
  func.func @_emb_pos_kernel(%arg0: i32, %arg1: i32, %arg2: memref<2x8xi32, #tpu.memory_space<smem>>, %arg3: memref<8x32xf32, #tpu.memory_space<vmem>>, %arg4: memref<64x32xf32, #tpu.memory_space<any>>, %arg5: memref<8x32xf32, #tpu.memory_space<vmem>>, %arg6: memref<8x32xf32, #tpu.memory_space<vmem>>, %arg7: memref<8x!tpu.dma_semaphore, #tpu.memory_space<semaphore_mem>>) attributes {dimension_semantics = [#tpu.dimension_semantics<parallel>, #tpu.dimension_semantics<parallel>], iteration_bounds = array<i64: 2, 1>, scalar_prefetch = 1 : i64, scratch_operands = 2 : i64, tpu.core_type = #tpu.core_type<tc>, window_params = [{transform_indices = @transform_0, window_bounds = array<i64: 8, 32>}, {}, {transform_indices = @transform_2, window_bounds = array<i64: 8, 32>}]} {
    %c8_i32 = arith.constant 8 : i32
    %0 = arith.muli %arg1, %c8_i32 : i32
    %c0_i32 = arith.constant 0 : i32
    %c8_i32_0 = arith.constant 8 : i32
    %1 = arith.addi %c0_i32, %c8_i32_0 : i32
    %c1_i32 = arith.constant 1 : i32
    scf.for %arg8 = %c0_i32 to %1 step %c1_i32  : i32 {
      %c1_i32_11 = arith.constant 1 : i32
      %7 = arith.muli %arg8, %c1_i32_11 : i32
      %c0_i32_12 = arith.constant 0 : i32
      %8 = arith.addi %c0_i32_12, %7 : i32
      %9 = arith.addi %0, %8 : i32
      %10 = arith.index_cast %arg0 : i32 to index
      %11 = arith.index_cast %9 : i32 to index
      %12 = memref.load %arg2[%10, %11] : memref<2x8xi32, #tpu.memory_space<smem>>
      %c0_i32_13 = arith.constant 0 : i32
      %13 = arith.maxsi %12, %c0_i32_13 : i32
      %c63_i32 = arith.constant 63 : i32
      %14 = arith.minsi %13, %c63_i32 : i32
      %c0_i32_14 = arith.constant 0 : i32
      %15 = tpu.memref_slice %arg4[%14, %c0_i32_14] : memref<64x32xf32, #tpu.memory_space<any>> -> memref<1x32xf32, #tpu.memory_space<any>>
      %c0_i32_15 = arith.constant 0 : i32
      %16 = tpu.memref_slice %arg6[%8, %c0_i32_15] : memref<8x32xf32, #tpu.memory_space<vmem>> -> memref<1x32xf32, #tpu.memory_space<vmem>>
      %17 = tpu.memref_slice %arg7[%8] : memref<8x!tpu.dma_semaphore, #tpu.memory_space<semaphore_mem>> -> memref<1x!tpu.dma_semaphore, #tpu.memory_space<semaphore_mem>>
      %18 = tpu.memref_squeeze %17 : memref<1x!tpu.dma_semaphore, #tpu.memory_space<semaphore_mem>> -> memref<!tpu.dma_semaphore, #tpu.memory_space<semaphore_mem>>
      tpu.enqueue_dma source(%15 : memref<1x32xf32, #tpu.memory_space<any>>) target(%16 : memref<1x32xf32, #tpu.memory_space<vmem>>) target_semaphore(%18 : memref<!tpu.dma_semaphore, #tpu.memory_space<semaphore_mem>>)
    }
    %c8_i32_1 = arith.constant 8 : i32
    %c0_i32_2 = arith.constant 0 : i32
    %c8_i32_3 = arith.constant 8 : i32
    %2 = arith.addi %c0_i32_2, %c8_i32_3 : i32
    %c1_i32_4 = arith.constant 1 : i32
    scf.for %arg8 = %c0_i32_2 to %2 step %c1_i32_4  : i32 {
      %c1_i32_11 = arith.constant 1 : i32
      %7 = arith.muli %arg8, %c1_i32_11 : i32
      %c0_i32_12 = arith.constant 0 : i32
      %8 = arith.addi %c0_i32_12, %7 : i32
      %c0_i32_13 = arith.constant 0 : i32
      %c0_i32_14 = arith.constant 0 : i32
      %9 = tpu.memref_slice %arg4[%c0_i32_13, %c0_i32_14] : memref<64x32xf32, #tpu.memory_space<any>> -> memref<1x32xf32, #tpu.memory_space<any>>
      %c0_i32_15 = arith.constant 0 : i32
      %10 = tpu.memref_slice %arg6[%8, %c0_i32_15] : memref<8x32xf32, #tpu.memory_space<vmem>> -> memref<1x32xf32, #tpu.memory_space<vmem>>
      %11 = tpu.memref_slice %arg7[%8] : memref<8x!tpu.dma_semaphore, #tpu.memory_space<semaphore_mem>> -> memref<1x!tpu.dma_semaphore, #tpu.memory_space<semaphore_mem>>
      %12 = tpu.memref_squeeze %11 : memref<1x!tpu.dma_semaphore, #tpu.memory_space<semaphore_mem>> -> memref<!tpu.dma_semaphore, #tpu.memory_space<semaphore_mem>>
      tpu.wait_dma2 semaphore(%12 : memref<!tpu.dma_semaphore, #tpu.memory_space<semaphore_mem>>) src(%9 : memref<1x32xf32, #tpu.memory_space<any>>) dst(%10 : memref<1x32xf32, #tpu.memory_space<vmem>>)
    }
    %c8_i32_5 = arith.constant 8 : i32
    %c0 = arith.constant 0 : index
    %c0_6 = arith.constant 0 : index
    %3 = vector.load %arg6[%c0, %c0_6] : memref<8x32xf32, #tpu.memory_space<vmem>>, vector<8x32xf32>
    %c0_7 = arith.constant 0 : index
    %c0_8 = arith.constant 0 : index
    %4 = vector.load %arg3[%c0_7, %c0_8] : memref<8x32xf32, #tpu.memory_space<vmem>>, vector<8x32xf32>
    %5 = arith.addf %3, %4 : vector<8x32xf32>
    %c0_9 = arith.constant 0 : index
    %c0_10 = arith.constant 0 : index
    %6 = vector.load %arg5[%c0_9, %c0_10] : memref<8x32xf32, #tpu.memory_space<vmem>>, vector<8x32xf32>
    tpu.vector_store %arg5[%c0_9, %c0_10], %5 {strides = array<i32>} : memref<8x32xf32, #tpu.memory_space<vmem>>, vector<8x32xf32>,
    return
  }
  func.func @transform_0(%arg0: i32, %arg1: i32, %arg2: memref<2x8xi32, #tpu.memory_space<smem>>) -> (i32, i32) {
    %c0_i32 = arith.constant 0 : i32
    %c0_i32_0 = arith.constant 0 : i32
    return %arg1, %c0_i32 : i32, i32
  }
  func.func @transform_2(%arg0: i32, %arg1: i32, %arg2: memref<2x8xi32, #tpu.memory_space<smem>>) -> (i32, i32) {
    %c1_i32 = arith.constant 1 : i32
    %0 = arith.muli %arg0, %c1_i32 : i32
    %1 = arith.addi %0, %arg1 : i32
    %c0_i32 = arith.constant 0 : i32
    %c0_i32_0 = arith.constant 0 : i32
    return %1, %c0_i32 : i32, i32
  }
}

</mosaic_0001>

<bundles_post_ra>
// kernel: tpu_custom_call.1
= control target key start
LH: loop header
LB: loop body
LE: loop exit
PB: predicated region body
PF: predicated region fallthrough
CT: control target
= control target key end

     0   :  { %s735_s0 = inlined_call_operand.vmem [shape: s32[2,8], index: 0, kind: input, shape index: {}]   ;;  %s736_s1 = inlined_call_operand.vmem [shape: f32[8,32], index: 1, kind: input, shape index: {}]   ;;  %s737_s2 = inlined_call_operand.vmem [shape: f32[64,32], index: 2, kind: input, shape index: {}]   ;;  %s738_s3 = inlined_call_operand.hbm [shape: f32[16,32], index: 3, kind: output, shape index: {}]  }
   0x1   :  { %s8_s14 = sshll.u32 %s735_s0, 4  ;;  %s9_s14 = int_to_ptr.vmem [resolvable:$true] %s8_s14 }
   0x2   :  { %s482_s15 = scalar_lea.vmem %s9_s14, 32  ;;  %p487_p1 = scmp.lt.s32.totalorder %s9_s14, %s9_s14 }
   0x3   :  { %p483_p0 = scmp.ne.s32.totalorder %s9_s14, %s482_s15  ;;  %p488_p2 = scmp.lt.s32.totalorder %s482_s15, %s482_s15 }
   0x5   :  { %p489_p3 = por %p488_p2, %p487_p1 }
   0x7   :  { %p490_p4 = pnand %p489_p3, %p483_p0 }
   0x9   :  { %493 = shalt.err (!%p490_p4)  }
   0xa   :  { %s592_s16 = smov [#allocation5]  }
   0xb   :  { %11 = dma.vmem_to_smem %s9_s14, 32, %s592_s16, [#allocation4] }
   0xc   :  { %552 = dma.done.wait [#allocation4], 32 }
   0xd   :  { %553 = vsyncadd [#allocation4], 4294967264 }
   0xe   :  { %13 = sfence }
   0xf   :  { %14 = vsyncpa [#allocation7], 0 }
  0x10   :  { %16 = vsyncpa [#allocation7 + $0x1], 0  ;;  %s617_s17 = smov 0   ;;  %s619_s18 = smov 0  }
  0x11   :  { %s621_s0 = smov 0   ;;  %s623_s19 = smov 0  }
  0x12   :  { %s625_s20 = smov 0   ;;  %s627_s21 = smov 0  }
  0x13 LB: > { %s384_s22 = sadd.s32 4294967295, %s582_s21   ;;  %s385_s23 = sadd.s32 4294967294, %s582_s21   ;;  %s582_s21 = sphi %s627_s21, %s22_s21   ;;  %s578_s20 = sphi %s625_s20, %s745_s20   ;;  %s574_s19 = sphi %s623_s19, %s744_s19   ;;  %s570_s0 = sphi %s621_s0, %s743_s0   ;;  %s566_s18 = sphi %s619_s18, %s742_s18   ;;  %s562_s17 = sphi %s617_s17, %s741_s17  }
  0x14   : > { %s34_s24 = sadd.s32 1, %s578_s20  ;;  %s69_s25 = sadd.s32 1, %s570_s0 }
  0x15   : > { %p36_p5 = scmp.ge.s32.totalorder %s34_s24, 2  ;;  %p79_p6 = scmp.ne.s32.totalorder %s570_s0, %s566_s18 }
  0x16   : > { %p80_p7 = scmp.eq.s32.totalorder %s384_s22, 1  ;;  %p85_p8 = scmp.ne.s32.totalorder %s566_s18, %s562_s17 }
  0x17   : > { %s747_s24 = smov (%p36_p5, %s34_s24), 0  ;;  %p86_p10 = scmp.eq.s32.totalorder %s385_s23, 1 }
  0x18   : > { %p657_p9 = por %p80_p7, %p79_p6  ;;  %s66_s27 = ssub.s32 %s578_s20, %s747_s24 }
  0x19   : > { %p388_p11 = scmp.ge.s32.totalorder %s582_s21, 1  ;;  %p67_p12 = scmp.eq.s32.totalorder %s66_s27, 0 }
  0x1a   : > { %p664_p13 = por %p86_p10, %p85_p8  ;;  %p111_p0 = scmp.lt.s32.totalorder %s582_s21, 3 }
  0x1b   : > { %s670_s29 = scalar_select %p67_p12, %s570_s0, %s69_s25  }
  0x1c   : > { %p112_p1 = pnand %p388_p11, %p111_p0 }
  0x1d   : > { %s127_s30 = sand.u32 (!%p112_p1), 1, %s566_s18   ;;  %s584_s6 = smov (!%p112_p1), 0  }
  0x1e   : > { %115 = sbr.rel (%p112_p1) target bundleno = 88 (0x58), region = 24  ;;  %s675_s4 = sshll.u32 (!%p112_p1), %s127_s30, 3 }
  0x1f   : > { %s129_s5 = scalar_lea.vmem (!%p112_p1), [#allocation6], %s675_s4 }
  0x23 LB: >> { %s143_s7 = sshra.s32 %s586_s6, 7  ;;  %s148_s8 = sand.u32 127, %s586_s6  ;;  %s586_s6 = sphi %s584_s6, %s141_s6  }
  0x24   : >> { %s145_s9 = sadd.s32 %s574_s19, %s143_s7  ;;  %s156_s16 = scalar_lea.vmem [#allocation2], %s586_s6 }
  0x25   : >> { %s390_s10 = sshll.u32 %s145_s9, 7  ;;  %s157_s22 = scalar_lea.sflag [#allocation3], %s586_s6 }
  0x26   : >> { %s149_s11 = sadd.s32 %s390_s10, %s148_s8 }
  0x27   : >> { %s150_s12 = sld [smem:[#allocation5 + %s149_s11]] }
  0x2d   : >> { %p151_p2 = scmp.gt.s32.totalorder %s150_s12, 0  ;;  %p391_p3 = scmp.lt.s32.totalorder %s150_s12, 63 }
  0x2f   : >> { %s749_s12 = smov (!%p151_p2, %s150_s12), 0 }
  0x30   : >> { %s751_s12 = smov (!%p391_p3, %s749_s12), 63 }
  0x31   : >> { %s155_s15 = scalar_lea.vmem %s737_s2, %s751_s12 }
  0x32   : >> { %v176_v0 = vld [vmem:[%s155_s15] sm:$0x1] }
  0x33   : >> { %177 = vst [vmem:[%s156_s16] sm:$0x1] %v176_v0 }
  0x34   : >> { %203 = vsyncadd %s157_s22, 16  ;;  %s141_s6 = sadd.s32 1, %s586_s6  }
  0x35   : >> { %p138_p4 = scmp.ge.s32.totalorder %s141_s6, 8  }
  0x36   : > { %s588_s23 = smov (%p138_p4), 0  }
  0x37   : > { %140 = sbr.rel (!%p138_p4) target bundleno = 35 (0x23), region = 124 }
  0x3c LB: >> { %s210_s25 = scalar_lea.sflag [#allocation3], %s590_s23  ;;  %s590_s23 = sphi %s588_s23, %s209_s23  }
  0x3d   : >> { %554 = dma.done.wait %s210_s25, 16 }
  0x3e   : >> { %555 = vsyncadd %s210_s25, 4294967280  ;;  %s209_s23 = sadd.s32 1, %s590_s23  }
  0x3f   : >> { %p206_p5 = scmp.ge.s32.totalorder %s209_s23, 8  }
  0x40   : > { %v214_v1 = vld [vmem:[#allocation2] sm:$0xff] (%p206_p5)  ;;  %vm217_vm0 = vcmask (%p206_p5), 261120   ;;  %s397_s6 = sshll.u32 (%p206_p5), %s574_s19, 7  ;;  %s234_s11 = sshll.u32 (%p206_p5), %s129_s5, 4  ;;  %s235_s11 = int_to_ptr.vmem [resolvable:$true] %s234_s11 }
  0x41   : > { %208 = sbr.rel (!%p206_p5) target bundleno = 60 (0x3c), region = 135  ;;  %v215_v2 = vld [vmem:[%s736_s1] sm:$0xff] (%p206_p5)  ;;  %s689_s10 = scalar_lea.hbm (%p206_p5), %s738_s3, %s397_s6 }
  0x42   : > { %v216_v3 = vadd.f32 (%p206_p5), %v215_v2, %v214_v1  ;;  %s220_s12 = scalar_lea.sflag (%p206_p5), [#allocation7], %s127_s30  ;;  %s494_s13 = scalar_lea.vmem (%p206_p5), %s235_s11, 128 }
  0x43   : > { %p495_p6 = scmp.ne.s32.totalorder (%p206_p5), %s235_s11, %s494_s13  ;;  %s593_s14 = smov (%p206_p5), [#allocation6]  }
  0x44   : > { %218 = vst.msk [vmem:[%s129_s5] sm:$0xff] (%p206_p5), %vm217_vm0, %v216_v3  ;;  %s498_s19 = sshll.u32 (%p206_p5), %s593_s14, 4  ;;  %s499_s19 = int_to_ptr.vmem [resolvable:$false] %s498_s19 }
  0x45   : > { %p496_p7 = pnand (%p206_p5), %p495_p6, %p657_p9  ;;  %s500_s15 = scalar_lea.vmem (%p206_p5), %s499_s19, 256 }
  0x46   : > { %p501_p10 = scmp.lt.s32.totalorder %s235_s11, %s499_s19  ;;  %p502_p11 = scmp.lt.s32.totalorder %s500_s15, %s494_s13 }
  0x47   : > { %p497_p8 = pneg %p496_p7 }
  0x48   : > { %p503_p12 = por %p502_p11, %p501_p10 }
  0x4a   : > { %p504_p0 = pnand %p503_p12, %p497_p8 }
  0x4c   : > { %507 = shalt.err (!%p504_p0)
}
  0x4d   : > { %s508_s4 = scalar_lea.hbm %s689_s10, 128  ;;  %s512_s16 = scalar_lea.hbm %s738_s3, 256 }
  0x4e   : > { %p509_p1 = scmp.ne.s32.totalorder %s689_s10, %s508_s4  ;;  %p513_p4 = scmp.lt.s32.totalorder %s689_s10, %s738_s3 }
  0x4f   : > { %p514_p5 = scmp.lt.s32.totalorder %s512_s16, %s508_s4 }
  0x50   : > { %p510_p2 = pnand %p509_p1, %p657_p9 }
  0x51   : > { %p515_p6 = por %p514_p5, %p513_p4 }
  0x52   : > { %p511_p3 = pneg %p510_p2 }
  0x54   : > { %p516_p7 = pnand %p515_p6, %p511_p3 }
  0x56   : > { %519 = shalt.err (!%p516_p7)
}
  0x57   : > { %410 = dma.vmem_to_hbm [thread:$0]  (%p657_p9), %s235_s11, 128, %s689_s10, %s220_s12  }
  0x58 PF: > { %p416_p8 = scmp.ge.s32.totalorder %s582_s21, 2  ;;  %s246_s25 = sand.u32 1, %s562_s17  }
  0x59   : > { %s247_s27 = scalar_lea.sflag [#allocation7], %s246_s25 }
  0x5a   : > { %p413_p10 = pnand %p416_p8, %p664_p13 }
  0x5c   : > { %p414_p11 = pneg %p413_p10 }
  0x5e   : > { %557 = dma.done.wait (%p414_p11), %s247_s27, 128  }
  0x5f   : > { %559 = vsyncadd (%p414_p11), %s247_s27, 4294967168  ;;  %s22_s21 = sadd.s32 1, %s582_s21   ;;  %s741_s17 = smov %s566_s18 }
  0x60   : > { %p19_p12 = scmp.ge.s32.totalorder %s22_s21, 4   ;;  %s742_s18 = smov %s570_s0 }
  0x61   : > { %s743_s0 = smov %s670_s29  ;;  %s744_s19 = smov %s578_s20 }
  0x62   : > { %s745_s20 = smov %s747_s24  ;;  %21 = sbr.rel (!%p19_p12) target bundleno = 19 (0x13), region = 146 }
  0x67   :  { %252 = vsyncpa [#allocation7], 1 }
  0x68   :  { %254 = vsyncpa [#allocation7 + $0x1], 1 }
  0x69   :  { %255 = vsyncmov [#allocation3] }
  0x6c   :  { %s256_s26 = vpop.sfrf %255 }
  0x6d   :  { %p400_p9 = scmp.ne.s32.totalorder %s256_s26, 0 }
  0x6f   :  { %260 = shalt.err (%p400_p9)  }
  0x70   :  { %262 = vsyncmov [#allocation3 + $0x1] }
  0x73   :  { %s263_s28 = vpop.sfrf %262 }
  0x74   :  { %p401_p13 = scmp.ne.s32.totalorder %s263_s28, 0 }
  0x76   :  { %267 = shalt.err (%p401_p13)  }
  0x77   :  { %269 = vsyncmov [#allocation3 + $0x2] }
  0x7a   :  { %s270_s7 = vpop.sfrf %269 }
  0x7b   :  { %p402_p0 = scmp.ne.s32.totalorder %s270_s7, 0 }
  0x7d   :  { %274 = shalt.err (%p402_p0)  }
  0x7e   :  { %276 = vsyncmov [#allocation3 + $0x3] }
  0x81   :  { %s277_s29 = vpop.sfrf %276 }
  0x82   :  { %p403_p1 = scmp.ne.s32.totalorder %s277_s29, 0 }
  0x84   :  { %281 = shalt.err (%p403_p1)  }
  0x85   :  { %283 = vsyncmov [#allocation3 + $0x4] }
  0x88   :  { %s284_s21 = vpop.sfrf %283 }
  0x89   :  { %p404_p2 = scmp.ne.s32.totalorder %s284_s21, 0 }
  0x8b   :  { %288 = shalt.err (%p404_p2)  }
  0x8c   :  { %290 = vsyncmov [#allocation3 + $0x5] }
  0x8f   :  { %s291_s1 = vpop.sfrf %290 }
  0x90   :  { %p405_p3 = scmp.ne.s32.totalorder %s291_s1, 0 }
  0x92   :  { %295 = shalt.err (%p405_p3)  }
  0x93   :  { %297 = vsyncmov [#allocation3 + $0x6] }
  0x96   :  { %s298_s2 = vpop.sfrf %297 }
  0x97   :  { %p406_p4 = scmp.ne.s32.totalorder %s298_s2, 0 }
  0x99   :  { %302 = shalt.err (%p406_p4)  }
  0x9a   :  { %304 = vsyncmov [#allocation3 + $0x7] }
  0x9d   :  { %s305_s3 = vpop.sfrf %304 }
  0x9e   :  { %p407_p5 = scmp.ne.s32.totalorder %s305_s3, 0 }
  0xa0   :  { %309 = shalt.err (%p407_p5)  }

</bundles_post_ra>
